<compile_context>
chip_gen: v6e
topology: v6e:2x2x1
jax: 0.10.0
libtpu: 0.0.40
codegen_flags: <defaults>
</compile_context>

<pallas_src>
from typing import NamedTuple

import jax
import jax.numpy as jnp
from jax.experimental import pallas as pl
from jax.experimental.pallas import tpu as pltpu


def _round_up(v, mult):
    return ((v + mult - 1) // mult) * mult


# ---------------------------------------------------------------------------
# Kernels
# ---------------------------------------------------------------------------
def _sae_kernel_acc_in_out(x_ref, we_ref, be_ref, wd_ref, bd_ref, xhat_ref, f_ref):
    """One (batch tile, m tile) step; x_hat accumulated directly in the f32 output.

    x_ref  : (TB, n_pad)  activations tile (compute dtype)
    we_ref : (n_pad, TM)  encoder-weight tile
    be_ref : (1, TM)      encoder-bias tile
    wd_ref : (TM, n_pad)  decoder-weight tile
    bd_ref : (1, n_pad)   decoder bias (grid-invariant)
    xhat_ref : (TB, n_pad) f32 reconstruction tile, resident across the m axis
    f_ref  : (TB, TM)     dictionary activations tile
    """
    mi = pl.program_id(1)

    @pl.when(mi == 0)
    def _init():
        xhat_ref[...] = jnp.broadcast_to(
            bd_ref[...].astype(xhat_ref.dtype), xhat_ref.shape
        )

    pre = jnp.dot(x_ref[...], we_ref[...], preferred_element_type=jnp.float32)
    f = jnp.maximum(pre + be_ref[...].astype(jnp.float32), 0.0)
    f_ref[...] = f.astype(f_ref.dtype)

    xhat_ref[...] += jnp.dot(
        f.astype(wd_ref.dtype), wd_ref[...], preferred_element_type=jnp.float32
    )


def _sae_kernel_scratch(x_ref, we_ref, be_ref, wd_ref, bd_ref, xhat_ref, f_ref,
                        acc_ref):
    """Same as above, but with an f32 scratch accumulator (non-f32 x_hat output)."""
    mi = pl.program_id(1)
    num_m = pl.num_programs(1)

    @pl.when(mi == 0)
    def _init():
        acc_ref[...] = jnp.zeros_like(acc_ref)

    pre = jnp.dot(x_ref[...], we_ref[...], preferred_element_type=jnp.float32)
    f = jnp.maximum(pre + be_ref[...].astype(jnp.float32), 0.0)
    f_ref[...] = f.astype(f_ref.dtype)

    acc_ref[...] += jnp.dot(
        f.astype(wd_ref.dtype), wd_ref[...], preferred_element_type=jnp.float32
    )

    @pl.when(mi == num_m - 1)
    def _finalize():
        xhat_ref[...] = (
            acc_ref[...] + bd_ref[...].astype(jnp.float32)
        ).astype(xhat_ref.dtype)


# ---------------------------------------------------------------------------
# Parameter preparation (done once, outside the per-call hot path)
# ---------------------------------------------------------------------------
class SAEParams(NamedTuple):
    n: int
    m: int
    n_pad: int
    m_pad: int
    w_enc: jax.Array   # (n_pad, m_pad), compute dtype
    b_enc: jax.Array   # (1, m_pad),    original dtype
    w_dec: jax.Array   # (m_pad, n_pad), compute dtype
    b_dec: jax.Array   # (1, n_pad),    original dtype


def prepare_sae_params(w_enc, b_enc, w_dec, b_dec, *, compute_dtype=jnp.bfloat16):
    """Pad weights to 128-multiples and cast to the MXU compute dtype, once."""
    n, m = w_enc.shape
    assert w_dec.shape == (m, n), w_dec.shape
    assert b_enc.shape == (m,) and b_dec.shape == (n,)
    n_pad = _round_up(n, 128)
    m_pad = _round_up(m, 128)
    we = jnp.pad(w_enc, ((0, n_pad - n), (0, m_pad - m))).astype(compute_dtype)
    wd = jnp.pad(w_dec, ((0, m_pad - m), (0, n_pad - n))).astype(compute_dtype)
    be = jnp.pad(b_enc, (0, m_pad - m)).reshape(1, m_pad)
    bd = jnp.pad(b_dec, (0, n_pad - n)).reshape(1, n_pad)
    return SAEParams(n, m, n_pad, m_pad, we, be, wd, bd)


def _tpu_vmem_budget():
    """Returns (vmem budget in bytes, is_small_vmem_chip)."""
    try:
        cap = int(pltpu.get_tpu_info().vmem_capacity_bytes)
    except Exception:
        # Conservative fallback that fits every generation.
        return 48 * 1024 * 1024, False
    small = cap <= 64 * 1024 * 1024            # v7x fingerprint (64 MiB / TC)
    budget = min(cap - 12 * 1024 * 1024, 112 * 1024 * 1024)
    return max(budget, 32 * 1024 * 1024), small


# ---------------------------------------------------------------------------
# Fused forward
# ---------------------------------------------------------------------------
def sae_forward(x, params: SAEParams, *, tile_b=256, tile_m=512,
                out_dtype=None, f_dtype=None, min_batch_blocks=None):
    """Fused SAE forward. Returns (x_hat, f), matching AutoEncoderBase.forward."""
    B, n = x.shape
    assert n == params.n, (n, params.n)
    n_pad, m_pad = params.n_pad, params.m_pad
    compute_dtype = params.w_enc.dtype
    out_dtype = jnp.dtype(out_dtype) if out_dtype is not None else jnp.dtype(x.dtype)
    f_dtype = jnp.dtype(f_dtype) if f_dtype is not None else jnp.dtype(x.dtype)

    vmem_budget, small_vmem = _tpu_vmem_budget()
    if min_batch_blocks is None:
        # On 2-TC (small-VMEM) chips make sure the "parallel" batch axis has
        # at least 2 tiles so the second TensorCore is not idle.
        min_batch_blocks = 2 if small_vmem else 1

    # ---- batch tile ----
    tile_b = max(8, _round_up(int(tile_b), 8))
    b_ceil8 = _round_up(B, 8)
    tile_b = min(tile_b, b_ceil8)
    if min_batch_blocks > 1 and b_ceil8 >= 8 * min_batch_blocks:
        tile_b = min(tile_b, _round_up(-(-b_ceil8 // min_batch_blocks), 8))

    # ---- dictionary tile: largest 128-multiple divisor of m_pad <= request ----
    m_blocks = m_pad // 128
    divisors = [128 * d for d in range(1, m_blocks + 1) if m_blocks % d == 0]
    tile_m_req = max(128, min(int(tile_m), m_pad))
    cand = [t for t in divisors if t <= tile_m_req] or [128]

    cbytes = jnp.dtype(compute_dtype).itemsize
    out_bytes = out_dtype.itemsize
    f_bytes = f_dtype.itemsize
    use_scratch = out_dtype != jnp.dtype(jnp.float32)

    def vmem_est(tb, tm):
        est = (2 * tb * n_pad * cbytes                       # x tile (dbl-buffered)
               + 2 * n_pad * tm * cbytes                     # W_enc tile
               + 2 * tm * n_pad * cbytes                     # W_dec tile
               + 2 * 8 * tm * params.b_enc.dtype.itemsize    # b_enc (sublane pad)
               + 2 * 8 * n_pad * params.b_dec.dtype.itemsize # b_dec
               + 2 * tb * n_pad * out_bytes                  # x_hat tile
               + 2 * tb * tm * f_bytes)                      # f tile
        if use_scratch:
            est += tb * n_pad * 4
        return est

    # Generation-aware shrink: fit ~1.25x estimate under the VMEM budget.
    i = len(cand) - 1
    while i > 0 and 5 * vmem_est(tile_b, cand[i]) > 4 * vmem_budget:
        i -= 1
    tile_m = cand[i]
    while tile_b > 8 and 5 * vmem_est(tile_b, tile_m) > 4 * vmem_budget:
        tile_b = max(8, _round_up(tile_b // 2, 8))

    b_pad = _round_up(B, tile_b)
    grid = (b_pad // tile_b, m_pad // tile_m)

    # Only the activations are padded/cast per call; weights were prepared once.
    x_p = jnp.pad(x, ((0, b_pad - B), (0, n_pad - n))).astype(compute_dtype)

    est = vmem_est(tile_b, tile_m)
    vmem_limit = int(min(max(est + est // 4, 32 * 1024 * 1024), vmem_budget))

    flops = 4 * b_pad * n_pad * m_pad                       # two matmuls
    bytes_accessed = int(
        x_p.size * cbytes
        + params.w_enc.size * cbytes + params.w_dec.size * cbytes
        + params.b_enc.size * params.b_enc.dtype.itemsize
        + params.b_dec.size * params.b_dec.dtype.itemsize
        + b_pad * n_pad * out_bytes + b_pad * m_pad * f_bytes
    )

    kernel = _sae_kernel_scratch if use_scratch else _sae_kernel_acc_in_out
    scratch = [pltpu.VMEM((tile_b, n_pad), jnp.float32)] if use_scratch else []

    xhat_p, f_p = pl.pallas_call(
        kernel,
        out_shape=(
            jax.ShapeDtypeStruct((b_pad, n_pad), out_dtype),   # x_hat
            jax.ShapeDtypeStruct((b_pad, m_pad), f_dtype),     # f
        ),
        grid_spec=pltpu.PrefetchScalarGridSpec(
            num_scalar_prefetch=0,
            grid=grid,
            in_specs=[
                pl.BlockSpec((tile_b, n_pad), lambda bi, mi: (bi, 0)),   # x
                pl.BlockSpec((n_pad, tile_m), lambda bi, mi: (0, mi)),   # W_enc
                pl.BlockSpec((1, tile_m), lambda bi, mi: (0, mi)),       # b_enc
                pl.BlockSpec((tile_m, n_pad), lambda bi, mi: (mi, 0)),   # W_dec
                pl.BlockSpec((1, n_pad), lambda bi, mi: (0, 0)),         # b_dec
            ],
            out_specs=[
                pl.BlockSpec((tile_b, n_pad), lambda bi, mi: (bi, 0)),   # x_hat
                pl.BlockSpec((tile_b, tile_m), lambda bi, mi: (bi, mi)), # f
            ],
            scratch_shapes=scratch,
        ),
        compiler_params=pltpu.CompilerParams(
            dimension_semantics=("parallel", "arbitrary"),
            vmem_limit_bytes=vmem_limit,
        ),
        cost_estimate=pl.CostEstimate(
            flops=int(flops), transcendentals=0, bytes_accessed=bytes_accessed),
    )(x_p, params.w_enc, params.b_enc, params.w_dec, params.b_dec)

    return xhat_p[:B, :n], f_p[:B, :params.m]


# TODO(synk): training-time bookkeeping (checkpointing, neuron resampling,
# loss-list accumulation, plot/checkpoint I/O) is host-side stateful Python
# with no Pallas equivalent; only the forward compute path is implemented.


def _init_params(key, n, m, dtype=jnp.float32):
    """Deterministic Kaiming-uniform-style init for encoder/decoder weights."""
    k1, k2, k3, k4 = jax.random.split(key, 4)
    bound_enc = jnp.sqrt(6.0 / n)
    bound_dec = jnp.sqrt(6.0 / m)
    w_enc = jax.random.uniform(k1, (n, m), dtype, -bound_enc, bound_enc)
    w_dec = jax.random.uniform(k2, (m, n), dtype, -bound_dec, bound_dec)
    b_enc = 0.01 * jax.random.normal(k3, (m,), dtype)
    b_dec = 0.01 * jax.random.normal(k4, (n,), dtype)
    return w_enc, b_enc, w_dec, b_dec


def _rel_err(a, b):
    a = jnp.asarray(a, jnp.float32)
    b = jnp.asarray(b, jnp.float32)
    return float(jnp.linalg.norm(a - b) / (jnp.linalg.norm(b) + 1e-6))


if __name__ == "__main__":
    # Small, deliberately non-128-aligned shapes to exercise padding, multiple
    # batch tiles and the m-axis accumulation.
    B, n, m = 96, 80, 272

    key = jax.random.PRNGKey(0)
    kx, kp = jax.random.split(key)
    x = jax.random.normal(kx, (B, n), jnp.float32)
    w_enc, b_enc, w_dec, b_dec = _init_params(kp, n, m)

    # Pure-JAX reference of the forward semantics.
    f_ref = jnp.maximum(x @ w_enc + b_enc, 0.0)
    xhat_ref = f_ref @ w_dec + b_dec

    # 1) f32 compute path, tight tolerance; small tiles -> 3x3 grid, padding path.
    p32 = prepare_sae_params(w_enc, b_enc, w_dec, b_dec, compute_dtype=jnp.float32)
    x_hat, f = sae_forward(x, p32, tile_b=32, tile_m=128)
    jax.block_until_ready((x_hat, f))
    assert x_hat.shape == (B, n) and f.shape == (B, m)
    assert jnp.allclose(f, f_ref, atol=1e-4, rtol=1e-4)
    assert jnp.allclose(x_hat, xhat_ref, atol=1e-4, rtol=1e-4)

    # 2) bf16 weight/compute path (defaults: tile_b=256, tile_m=512), loose check.
    pbf = prepare_sae_params(w_enc, b_enc, w_dec, b_dec, compute_dtype=jnp.bfloat16)
    x_hat_b, f_b = sae_forward(x, pbf)
    jax.block_until_ready((x_hat_b, f_b))
    assert x_hat_b.shape == (B, n) and f_b.shape == (B, m)
    assert _rel_err(f_b, f_ref) < 2e-2
    assert _rel_err(x_hat_b, xhat_ref) < 2e-2

    # 3) bf16 outputs (scratch-accumulator kernel path) + batch padding path.
    x_hat_c, f_c = sae_forward(x, pbf, out_dtype=jnp.bfloat16,
                               f_dtype=jnp.bfloat16, tile_b=64, tile_m=128)
    jax.block_until_ready((x_hat_c, f_c))
    assert _rel_err(f_c, f_ref) < 3e-2
    assert _rel_err(x_hat_c, xhat_ref) < 3e-2

    print("KERNEL_OK")
</pallas_src>

<mosaic_0001>
module attributes {stable_mosaic.version = 11 : i64} {
  func.func @_sae_kernel_acc_in_out(%arg0: i32, %arg1: i32, %arg2: memref<32x128xf32, #tpu.memory_space<vmem>>, %arg3: memref<128x128xf32, #tpu.memory_space<vmem>>, %arg4: memref<1x128xf32, #tpu.memory_space<vmem>>, %arg5: memref<128x128xf32, #tpu.memory_space<vmem>>, %arg6: memref<1x128xf32, #tpu.memory_space<vmem>>, %arg7: memref<32x128xf32, #tpu.memory_space<vmem>>, %arg8: memref<32x128xf32, #tpu.memory_space<vmem>>) attributes {dimension_semantics = [#tpu.dimension_semantics<parallel>, #tpu.dimension_semantics<arbitrary>], iteration_bounds = array<i64: 3, 3>, scalar_prefetch = 0 : i64, scratch_operands = 0 : i64, tpu.core_type = #tpu.core_type<tc>, window_params = [{transform_indices = @transform_0, window_bounds = array<i64: 32, 128>}, {transform_indices = @transform_1, window_bounds = array<i64: 128, 128>}, {transform_indices = @transform_2, window_bounds = array<i64: 1, 128>}, {transform_indices = @transform_3, window_bounds = array<i64: 128, 128>}, {pipeline_mode = #tpu.pipeline_mode<synchronous>, transform_indices = @transform_4, window_bounds = array<i64: 1, 128>}, {transform_indices = @transform_5, window_bounds = array<i64: 32, 128>}, {transform_indices = @transform_6, window_bounds = array<i64: 32, 128>}]} {
    %c0_i32 = arith.constant 0 : i32
    %0 = arith.cmpi eq, %arg1, %c0_i32 : i32
    %1 = arith.extui %0 : i1 to i32
    %c0_i32_0 = arith.constant 0 : i32
    %2 = arith.cmpi ne, %1, %c0_i32_0 : i32
    scf.if %2 {
      %c0_16 = arith.constant 0 : index
      %c0_17 = arith.constant 0 : index
      %17 = vector.load %arg6[%c0_16, %c0_17] : memref<1x128xf32, #tpu.memory_space<vmem>>, vector<1x128xf32>
      %18 = vector.shape_cast %17 : vector<1x128xf32> to vector<1x128xf32>
      %19 = vector.broadcast %18 : vector<1x128xf32> to vector<32x128xf32>
      %c0_18 = arith.constant 0 : index
      %c0_19 = arith.constant 0 : index
      %20 = vector.load %arg7[%c0_18, %c0_19] : memref<32x128xf32, #tpu.memory_space<vmem>>, vector<32x128xf32>
      tpu.vector_store %arg7[%c0_18, %c0_19], %19 {strides = array<i32>} : memref<32x128xf32, #tpu.memory_space<vmem>>, vector<32x128xf32>,
    } else {
    }
    %c0 = arith.constant 0 : index
    %c0_1 = arith.constant 0 : index
    %3 = vector.load %arg2[%c0, %c0_1] : memref<32x128xf32, #tpu.memory_space<vmem>>, vector<32x128xf32>
    %c0_2 = arith.constant 0 : index
    %c0_3 = arith.constant 0 : index
    %4 = vector.load %arg3[%c0_2, %c0_3] : memref<128x128xf32, #tpu.memory_space<vmem>>, vector<128x128xf32>
    %cst = arith.constant dense<0.000000e+00> : vector<32x128xf32>
    %5 = tpu.matmul %3, %4, %cst {dimension_numbers = #tpu.dot_dimension_numbers<[1], [0], [0], [1], [0, 0, 1, 1], [], []>} : vector<32x128xf32>, vector<128x128xf32>, vector<32x128xf32> -> vector<32x128xf32>
    %c0_4 = arith.constant 0 : index
    %c0_5 = arith.constant 0 : index
    %6 = vector.load %arg4[%c0_4, %c0_5] : memref<1x128xf32, #tpu.memory_space<vmem>>, vector<1x128xf32>
    %7 = vector.broadcast %6 : vector<1x128xf32> to vector<32x128xf32>
    %8 = arith.addf %5, %7 : vector<32x128xf32>
    %cst_6 = arith.constant 0.000000e+00 : f32
    %9 = vector.broadcast %cst_6 : f32 to vector<32x128xf32>
    %10 = arith.maximumf %8, %9 : vector<32x128xf32>
    %c0_7 = arith.constant 0 : index
    %c0_8 = arith.constant 0 : index
    %11 = vector.load %arg8[%c0_7, %c0_8] : memref<32x128xf32, #tpu.memory_space<vmem>>, vector<32x128xf32>
    tpu.vector_store %arg8[%c0_7, %c0_8], %10 {strides = array<i32>} : memref<32x128xf32, #tpu.memory_space<vmem>>, vector<32x128xf32>,
    %c0_9 = arith.constant 0 : index
    %c0_10 = arith.constant 0 : index
    %12 = vector.load %arg7[%c0_9, %c0_10] : memref<32x128xf32, #tpu.memory_space<vmem>>, vector<32x128xf32>
    %c0_11 = arith.constant 0 : index
    %c0_12 = arith.constant 0 : index
    %13 = vector.load %arg5[%c0_11, %c0_12] : memref<128x128xf32, #tpu.memory_space<vmem>>, vector<128x128xf32>
    %cst_13 = arith.constant dense<0.000000e+00> : vector<32x128xf32>
    %14 = tpu.matmul %10, %13, %cst_13 {dimension_numbers = #tpu.dot_dimension_numbers<[1], [0], [0], [1], [0, 0, 1, 1], [], []>} : vector<32x128xf32>, vector<128x128xf32>, vector<32x128xf32> -> vector<32x128xf32>
    %15 = arith.addf %12, %14 : vector<32x128xf32>
    %c0_14 = arith.constant 0 : index
    %c0_15 = arith.constant 0 : index
    %16 = vector.load %arg7[%c0_14, %c0_15] : memref<32x128xf32, #tpu.memory_space<vmem>>, vector<32x128xf32>
    tpu.vector_store %arg7[%c0_14, %c0_15], %15 {strides = array<i32>} : memref<32x128xf32, #tpu.memory_space<vmem>>, vector<32x128xf32>,
    return
  }
  func.func @transform_0(%arg0: i32, %arg1: i32) -> (i32, i32) {
    %c0_i32 = arith.constant 0 : i32
    %c0_i32_0 = arith.constant 0 : i32
    return %arg0, %c0_i32 : i32, i32
  }
  func.func @transform_1(%arg0: i32, %arg1: i32) -> (i32, i32) {
    %c0_i32 = arith.constant 0 : i32
    %c0_i32_0 = arith.constant 0 : i32
    return %c0_i32, %arg1 : i32, i32
  }
  func.func @transform_2(%arg0: i32, %arg1: i32) -> (i32, i32) {
    %c0_i32 = arith.constant 0 : i32
    %c0_i32_0 = arith.constant 0 : i32
    return %c0_i32, %arg1 : i32, i32
  }
  func.func @transform_3(%arg0: i32, %arg1: i32) -> (i32, i32) {
    %c0_i32 = arith.constant 0 : i32
    %c0_i32_0 = arith.constant 0 : i32
    return %arg1, %c0_i32 : i32, i32
  }
  func.func @transform_4(%arg0: i32, %arg1: i32) -> (i32, i32) {
    %c0_i32 = arith.constant 0 : i32
    %c0_i32_0 = arith.constant 0 : i32
    %c0_i32_1 = arith.constant 0 : i32
    return %c0_i32, %c0_i32_0 : i32, i32
  }
  func.func @transform_5(%arg0: i32, %arg1: i32) -> (i32, i32) {
    %c0_i32 = arith.constant 0 : i32
    %c0_i32_0 = arith.constant 0 : i32
    return %arg0, %c0_i32 : i32, i32
  }
  func.func @transform_6(%arg0: i32, %arg1: i32) -> (i32, i32) {
    %c0_i32 = arith.constant 0 : i32
    return %arg0, %arg1 : i32, i32
  }
}

</mosaic_0001>

<bundles_post_ra>
// kernel: tpu_custom_call.1
= control target key start
LH: loop header
LB: loop body
LE: loop exit
PB: predicated region body
PF: predicated region fallthrough
CT: control target
= control target key end

     0   :  { %s1918_s0 = inlined_call_operand.hbm [shape: f32[96,128], index: 0, kind: input, shape index: {}]   ;;  %s1919_s1 = inlined_call_operand.hbm [shape: f32[128,384], index: 1, kind: input, shape index: {}]   ;;  %s1920_s2 = inlined_call_operand.vmem [shape: f32[1,384], index: 2, kind: input, shape index: {}]   ;;  %s1921_s3 = inlined_call_operand.hbm [shape: f32[384,128], index: 3, kind: input, shape index: {}]   ;;  %s1922_s4 = inlined_call_operand.vmem [shape: f32[1,128], index: 4, kind: input, shape index: {}]   ;;  %s1923_s5 = inlined_call_operand.hbm [shape: f32[96,128], index: 5, kind: output, shape index: {0}]   ;;  %s1924_s6 = inlined_call_operand.hbm [shape: f32[96,384], index: 6, kind: output, shape index: {1}]  }
   0x1   :  { %1947 = sst [smem:[#allocation29_spill]] %s1918_s0 }
   0x2   :  { %1948 = sst [smem:[#allocation30_spill]] %s1919_s1 }
   0x3   :  { %1949 = sst [smem:[#allocation31_spill]] %s1920_s2 }
   0x4   :  { %1950 = sst [smem:[#allocation32_spill]] %s1922_s4 }
   0x5   :  { %1951 = sst [smem:[#allocation33_spill]] %s1923_s5 }
   0x6   :  { %1952 = sst [smem:[#allocation34_spill]] %s1924_s6 }
   0x7   :  { %12 = vsyncpa [#allocation3], 0 }
   0x8   :  { %14 = vsyncpa [#allocation3 + $0x1], 0 }
   0x9   :  { %15 = vsyncpa [#allocation6], 0 }
   0xa   :  { %17 = vsyncpa [#allocation6 + $0x1], 0 }
   0xb   :  { %18 = vsyncpa [#allocation4], 0 }
   0xc   :  { %20 = vsyncpa [#allocation4 + $0x1], 0 }
   0xd   :  { %21 = vsyncpa [#allocation10], 0 }
   0xe   :  { %23 = vsyncpa [#allocation10 + $0x1], 0  ;;  %s1451_s21 = smov 0   ;;  %s1453_s22 = smov 0  }
   0xf   :  { %s1455_s23 = smov 0   ;;  %s1457_s24 = smov 0  }
  0x10   :  { %s1459_s25 = smov 0   ;;  %s1461_s26 = smov 0  }
  0x11   :  { %s1463_s27 = smov 0   ;;  %s1465_s28 = smov 0  }
  0x12   :  { %s1467_s29 = smov 0   ;;  %s1469_s30 = smov 0  }
  0x13   :  { %s1471_s7 = smov 0   ;;  %s1473_s8 = smov 0  }
  0x14   :  { %s1475_s9 = smov 0   ;;  %s1477_s10 = smov 0  }
  0x15 LB: > { %1953 = sst [smem:[#allocation15_spill]] %s1359_s23  ;;  %s1925_s11 = sadd.s32 1, %s1395_s8  ;;  %s1403_s10 = sphi %s1477_s10, %s29_s10   ;;  %s1399_s9 = sphi %s1475_s9, %s2019_s9   ;;  %s1395_s8 = sphi %s1473_s8, %s2009_s8   ;;  %s1391_s7 = sphi %s1471_s7, %s2018_s7   ;;  %s1387_s30 = sphi %s1469_s30, %s2007_s30   ;;  %s1383_s29 = sphi %s1467_s29, %s2017_s29   ;;  %s1379_s28 = sphi %s1465_s28, %s2016_s28   ;;  %s1375_s27 = sphi %s1463_s27, %s2015_s27   ;;  %s1371_s26 = sphi %s1461_s26, %s2005_s26   ;;  %s1367_s25 = sphi %s1459_s25, %s2014_s25   ;;  %s1363_s24 = sphi %s1457_s24, %s2013_s24   ;;  %s1359_s23 = sphi %s1455_s23, %s2003_s23   ;;  %s1355_s22 = sphi %s1453_s22, %s2012_s22   ;;  %s1351_s21 = sphi %s1451_s21, %s2011_s21  }
  0x16   : > { %1954 = sst [smem:[#allocation16_spill]] %s1371_s26  ;;  %p56_p0 = scmp.eq.s32.totalorder %s1403_s10, 0 }
  0x17   : > { %1955 = sst [smem:[#allocation17_spill]] %s1375_s27  ;;  %p1525_p1 = scmp.ge.s32.totalorder %s1925_s11, 3 }
  0x18   : > { %1956 = sst [smem:[#allocation18_spill]] %s1387_s30  ;;  %p81_p2 = scmp.ne.s32.totalorder %s1371_s26, %s1367_s25 }
  0x19   : > { %1957 = sst [smem:[#allocation19_spill]] %s1391_s7  ;;  %p87_p3 = scmp.ne.s32.totalorder %s1367_s25, %s1363_s24 }
  0x1a   : > { %1958 = sst [smem:[#allocation20_spill]] %s1395_s8  ;;  %p1936_p4 = scmp.lt.s32.totalorder %s1403_s10, 9 }
  0x1b   : > { %1959 = sst [smem:[#allocation21_spill]] %s1399_s9  ;;  %p83_p5 = por %p81_p2, %p56_p0 }
  0x1c   : > { %s262_s14 = sand.u32 1, %s1403_s10   ;;  %s264_s15 = sand.u32 1, %s1371_s26  }
  0x1d   : > { %s1539_s16 = sshll.u32 %s264_s15, 7  ;;  %s852_s17 = sshll.u32 %s1395_s8, 7 }
  0x1e   : > { %s1961_s1 = sld [smem:[#allocation30_spill]]  ;;  %s266_s11 = scalar_lea.vmem [#allocation5], %s1539_s16 }
  0x1f   : > { %s272_s5 = sshll.u32 %s266_s11, 4  ;;  %p1548_p6 = pnand %p1936_p4, %p83_p5  ;;  %s273_s5 = int_to_ptr.vmem [resolvable:$true] %s272_s5 }
  0x20   : > { %p856_p7 = scmp.ge.s32.totalorder %s1403_s10, 1  ;;  %s1553_s6 = scalar_lea.sflag [#allocation6], %s262_s14 }
  0x21   : > { %p1934_p8 = pneg %p1548_p6  ;;  %s1154_s15 = scalar_lea.vmem %s273_s5, 2048 }
  0x22   : > { %p1155_p9 = scmp.ne.s32.totalorder %s273_s5, %s1154_s15  ;;  %s1405_s11 = smov [#allocation5]  }
  0x24   : > { %s271_s20 = scalar_lea.hbm %s1961_s1, %s852_s17  ;;  %p1157_p10 = pnand %p1155_p9, %p1934_p8 }
  0x25   : > { %s1159_s17 = sshll.u32 %s1405_s11, 4  ;;  %s1160_s17 = int_to_ptr.vmem [resolvable:$false] %s1159_s17 }
  0x26   : > { %p1158_p11 = pneg %p1157_p10  ;;  %s1161_s18 = scalar_lea.vmem %s1160_s17, 4096 }
  0x27   : > { %p1162_p12 = scmp.lt.s32.totalorder %s273_s5, %s1160_s17  ;;  %p1163_p13 = scmp.lt.s32.totalorder %s1161_s18, %s1154_s15 }
  0x29   : > { %p1164_p2 = por %p1163_p13, %p1162_p12 }
  0x2b   : > { %p1165_p5 = pnand %p1164_p2, %p1158_p11 }
  0x2d   : > { %1168 = shalt.err (!%p1165_p5)
}
  0x2e   : > { %s1406_s19 = smov 384   ;;  %s1928_s14 = smov 128  }
  0x2f   : > { %s1930_s15 = smov 8   ;;  %p307_p9 = scmp.lt.s32.totalorder %s1403_s10, 10 }
  0x30   : > { %1010 = dma.hbm_to_vmem [thread:$0]  (!%p1548_p6), %s271_s20, 2048, %s273_s5, %s1553_s6, %s1406_s19, %s1928_s14, %s1930_s15  }
  0x31   : > { %p1568_p10 = pnand %p856_p7, %p307_p9  ;;  %s1573_s17 = sadd.s32 4294967295, %s1403_s10  }
  0x32   : > { %s845_s18 = sadd.s32 4294967294, %s1403_s10   ;;  %s1964_s1 = sadd.s32 1, %s1395_s8 }
  0x33   : > { %s2021_s1 = smov (%p1525_p1, %s1964_s1), 0  ;;  %s41_s5 = sadd.s32 1, %s1399_s9 }
  0x34   : > { %1965 = sst [smem:[#allocation22_spill]] %s2021_s1  ;;  %s48_s20 = sadd.s32 1, %s1383_s29 }
  0x35   : > { %s2023_s5 = smov (!%p1525_p1, %s41_s5), %s1399_s9  ;;  %p55_p7 = scmp.ne.s32.totalorder %s1383_s29, %s1379_s28 }
  0x36   : > { %p61_p11 = scmp.ne.s32.totalorder %s1379_s28, %s1375_s27  ;;  %p43_p12 = scmp.ge.s32.totalorder %s2023_s5, 3 }
  0x37   : > { %p62_p13 = scmp.eq.s32.totalorder %s1573_s17, 0  ;;  %p1597_p2 = por %p56_p0, %p55_p7 }
  0x38   : > { %s71_s14 = ssub.s32 %s1395_s8, %s2021_s1  ;;  %s2025_s5 = smov (%p43_p12, %s2023_s5), 0 }
  0x39   : > { %1967 = sst [smem:[#allocation23_spill]] %s2025_s5  ;;  %p1608_p1 = por %p62_p13, %p61_p11 }
  0x3a   : > { %p72_p5 = scmp.eq.s32.totalorder %s71_s14, 0  ;;  %s45_s15 = ssub.s32 %s1399_s9, %s2025_s5 }
  0x3b   : > { %p1617_p0 = por %p87_p3, %p62_p13  ;;  %p46_p9 = scmp.eq.s32.totalorder %s45_s15, 0 }
  0x3c   : > { %p184_p12 = scmp.eq.s32.totalorder %s1573_s17, 8  ;;  %s1971_s1 = sadd.s32 1, %s1371_s26 }
  0x3d   : > { %s1969_s7 = scalar_select %p1617_p0, 1, 0 }
  0x3e   : > { %s1625_s4 = scalar_select %p72_p5, %s1371_s26, %s1971_s1  }
  0x3f   : > { %1970 = sst [smem:[#allocation24_spill]] %s1969_s7  ;;  %p1633_p8 = por %p184_p12, %p55_p7 }
  0x40   : > { %1972 = sst [smem:[#allocation25_spill]] %s1625_s4  ;;  %p190_p4 = scmp.eq.s32.totalorder %s845_s18, 8 }
  0x41   : > { %s1628_s2 = scalar_select %p46_p9, %s1383_s29, %s48_s20  }
  0x42   : > { %s1974_s30 = scalar_select %p1633_p8, 1, 0 }
  0x43   : > { %1973 = sst [smem:[#allocation26_spill]] %s1628_s2  ;;  %s198_s24 = sor.u32 %s71_s14, %s45_s15 }
  0x44   : > { %s201_s5 = sadd.s32 1, %s1359_s23  ;;  %p1641_p3 = por %p190_p4, %p61_p11 }
  0x45   : > { %p199_p13 = scmp.eq.s32.totalorder %s198_s24, 0  ;;  %p211_p5 = scmp.ne.s32.totalorder %s1359_s23, %s1355_s22 }
  0x46   : > { %s1975_s7 = scalar_select %p1641_p3, 1, 0 }
  0x47   : > { %p217_p9 = scmp.ne.s32.totalorder %s1355_s22, %s1351_s21  ;;  %p1652_p7 = por %p211_p5, %p184_p12 }
  0x48   : > { %1976 = sst [smem:[#allocation27_spill]] %s1975_s7  ;;  %s241_s14 = sand.u32 1, %s1383_s29  }
  0x49   : > { %s1650_s1 = scalar_select %p199_p13, %s1359_s23, %s201_s5  }
  0x4a   : > { %p1656_p8 = por %p217_p9, %p190_p4  ;;  %s874_s15 = sshll.u32 %s1399_s9, 9 }
  0x4b   : > { %1977 = sst [smem:[#allocation28_spill]] %s1650_s1  ;;  %s848_s2 = sshll.u32 %s241_s14, 5 }
  0x4c   : > { %s1979_s18 = scalar_select %p1656_p8, 1, 0 }
  0x4d   : > { %s1980_s0 = sld [smem:[#allocation29_spill]]  ;;  %s245_s24 = scalar_lea.vmem [#allocation2], %s848_s2 }
  0x4e   : > { %s252_s27 = sshll.u32 %s245_s24, 4  ;;  %p1981_p11 = scmp.lt.s32.totalorder %s1403_s10, 9  ;;  %s253_s27 = int_to_ptr.vmem [resolvable:$true] %s252_s27 }
  0x4f   : > { %s875_s1 = sshll.u32 %s1395_s8, 11  ;;  %s242_s23 = scalar_lea.sflag [#allocation3], %s241_s14 }
  0x50   : > { %p1669_p13 = pnand %p1981_p11, %p1597_p2  ;;  %s1182_s9 = scalar_lea.vmem %s253_s27, 512 }
  0x51   : > { %p1183_p12 = scmp.ne.s32.totalorder %s253_s27, %s1182_s9  ;;  %s1409_s4 = smov [#allocation2]  }
  0x52   : > { %p1171_p4 = pneg %p1669_p13  ;;  %s1187_s26 = sshll.u32 %s1409_s4, 4  ;;  %s1188_s26 = int_to_ptr.vmem [resolvable:$false] %s1187_s26 }
  0x53   : > { %s251_s7 = scalar_lea.hbm %s1980_s0, %s874_s15  ;;  %s1189_s2 = scalar_lea.vmem %s1188_s26, 1024 }
  0x54   : > { %p1185_p5 = pnand %p1183_p12, %p1171_p4  ;;  %p1190_p8 = scmp.lt.s32.totalorder %s253_s27, %s1188_s26 }
  0x55   : > { %p1191_p3 = scmp.lt.s32.totalorder %s1189_s2, %s1182_s9 }
  0x56   : > { %p1186_p9 = pneg %p1185_p5 }
  0x57   : > { %p1192_p2 = por %p1191_p3, %p1190_p8 }
  0x59   : > { %p1193_p11 = pnand %p1192_p2, %p1186_p9 }
  0x5b   : > { %1196 = shalt.err (!%p1193_p11)
}
  0x5c   : > { %s1983_s19 = smov 8   ;;  %s1984_s15 = smov 128  }
  0x5d   : > { %1007 = dma.hbm_to_vmem [thread:$0]  (!%p1669_p13), %s251_s7, 512, %s253_s27, %s242_s23, %s1984_s15, %s1984_s15, %s1983_s19  }
  0x5e   : > { %s298_s0 = scalar_lea.hbm %s1921_s3, %s875_s1  ;;  %s292_s4 = scalar_lea.vmem [#allocation7], %s1539_s16 }
  0x5f   : > { %s299_s8 = sshll.u32 %s292_s4, 4  ;;  %p1985_p8 = pneg %p1548_p6  ;;  %s300_s8 = int_to_ptr.vmem [resolvable:$true] %s299_s8 }
  0x60   : > { %s1210_s26 = scalar_lea.vmem %s300_s8, 2048  ;;  %s1410_s9 = smov [#allocation7]  }
  0x61   : > { %p1211_p4 = scmp.ne.s32.totalorder %s300_s8, %s1210_s26  ;;  %s1215_s5 = sshll.u32 %s1410_s9, 4  ;;  %s1216_s5 = int_to_ptr.vmem [resolvable:$false] %s1215_s5 }
  0x62   : > { %s1217_s2 = scalar_lea.vmem %s1216_s5, 4096  ;;  %p1218_p5 = scmp.lt.s32.totalorder %s300_s8, %s1216_s5 }
  0x63   : > { %p1213_p3 = pnand %p1211_p4, %p1985_p8  ;;  %p1219_p9 = scmp.lt.s32.totalorder %s1217_s2, %s1210_s26 }
  0x65   : > { %p1214_p12 = pneg %p1213_p3  ;;  %p1220_p13 = por %p1219_p9, %p1218_p5 }
  0x67   : > { %p1221_p2 = pnand %p1220_p13, %p1214_p12 }
  0x69   : > { %1224 = shalt.err (!%p1221_p2)
}
  0x6a   : > { %1013 = dma.hbm_to_vmem [thread:$0]  (!%p1548_p6), %s298_s0, 2048, %s300_s8, %s1553_s6, %s1984_s15, %s1984_s15, %s1983_s19  }
  0x6b   : > { %311 = sbr.rel (%p1568_p10) target bundleno = 581 (0x245), region = 40  ;;  %s1697_s23 = sand.u32 (!%p1568_p10), 1, %s1379_s28  }
  0x6c   : > { %s857_s27 = sshll.u32 (!%p1568_p10), %s1697_s23, 5  ;;  %s314_s7 = scalar_lea.sflag (!%p1568_p10), [#allocation3], %s1697_s23 }
  0x6d   : > { %s1701_s16 = scalar_lea.vmem (!%p1568_p10), [#allocation2], %s857_s27 }
  0x70   : > { %1334 = dma.done.wait (%p1608_p1), %s314_s7, 512  }
  0x71   : > { %1336 = vsyncadd (%p1608_p1), %s314_s7, 4294966784  ;;  %s322_s6 = sand.u32 1, %s1573_s17   ;;  %s324_s8 = sand.u32 1, %s1367_s25  }
  0x72   : > { %s858_s13 = sshll.u32 %s324_s8, 7  ;;  %s323_s11 = scalar_lea.sflag [#allocation6], %s322_s6 }
  0x73   : > { %s1709_s1 = scalar_lea.vmem [#allocation5], %s858_s13 }
  0x74   : > { %1338 = dma.done.wait (%p1617_p0), %s323_s11, 4096  }
  0x75   : > { %1340 = vsyncadd (%p1617_p0), %s323_s11, 4294963200  ;;  %s1987_s19 = sld [smem:[#allocation18_spill]]  ;;  %s379_s12 = sand.u32 1, %s1355_s22  }
  0x76   : > { %s861_s15 = sshll.u32 %s379_s12, 5  ;;  %s1988_s4 = sld [smem:[#allocation31_spill]] }
  0x77   : > { %s1726_s9 = scalar_lea.vmem [#allocation7], %s858_s13  ;;  %s1728_s5 = scalar_lea.vmem [#allocation8], %s857_s27 }
  0x78   : > { %s1730_s2 = scalar_lea.vmem [#allocation9], %s861_s15 }
  0x7b   : > { %p383_p6 = scmp.lt.s32.totalorder %s1987_s19, 2  ;;  %p862_p10 = scmp.ne.s32.totalorder %s1987_s19, 0 }
  0x7c   : > { %s1989_s6 = sld [smem:[#allocation32_spill]] (!%p862_p10) }
  0x7d   : > { %s1720_s14 = scalar_select %p383_p6, %s1987_s19, 2 }
  0x7e   : > { %392 = sbr.rel (%p862_p10) target bundleno = 134 (0x86), region = 56 }
  0x7f   : > { %s385_s26 = scalar_lea.vmem %s1988_s4, %s1720_s14 }
  0x83   : > { %v863_v0 = vld [vmem:[%s1989_s6] ss:$0 sm:$0xff] }
  0x84   : > { %400 = vst [vmem:[%s1728_s5] sm:$0xff] %v863_v0  ;;  %401 = vst [vmem:[%s1728_s5 + $0x8] sm:$0xff] %v863_v0 }
  0x85   : > { %402 = vst [vmem:[%s1728_s5 + $0x10] sm:$0xff] %v863_v0  ;;  %403 = vst [vmem:[%s1728_s5 + $0x18] sm:$0xff] %v863_v0 }
  0x86 PF: > { %v423_v1 = vld [vmem:[%s1709_s1 + $0x78] sm:$0xff]  ;;  %v422_v2 = vld [vmem:[%s1709_s1 + $0x70] sm:$0xff]  ;;  %v421_v3 = vld [vmem:[%s1709_s1 + $0x68] sm:$0xff]  ;;  %s1992_s11 = sld [smem:[#allocation18_spill]]  ;;  %s674_s14 = sshll.u32 %s1730_s2, 4  ;;  %s1793_s14 = int_to_ptr.vmem [resolvable:$true] %s674_s14 }
  0x87   : > { %917 = vmatprep.subr.mxu0 %v423_v1  ;;  %v420_v4 = vld [vmem:[%s1709_s1 + $0x60] sm:$0xff]  ;;  %v419_v6 = vld [vmem:[%s1709_s1 + $0x58] sm:$0xff]  ;;  %v542_v8 = vld [vmem:[%s1726_s9 + $0x70] sm:$0xff]  ;;  %s1993_s4 = sld [smem:[#allocation34_spill]]  ;;  %s1225_s7 = scalar_lea.vmem %s1793_s14, 512 }
  0x88   : > { %918 = vmatpush3.msra.mxu0 %v423_v1  ;;  %v404_v5 = vld [vmem:[%s1701_s16] sm:$0xff]  ;;  %v543_v7 = vld [vmem:[%s1726_s9 + $0x78] sm:$0xff]  ;;  %v418_v9 = vld [vmem:[%s1709_s1 + $0x50] sm:$0xff]  ;;  %p1226_p1 = scmp.ne.s32.totalorder %s1793_s14, %s1225_s7  ;;  %s1411_s0 = smov [#allocation9]  }
  0x89   : > { %919 = vmatprep.subr.mxu0 %v422_v2  ;;  %949 = vmatprep.mubr.f32.mxu0 %v404_v5  ;;  %v541_v10 = vld [vmem:[%s1726_s9 + $0x68] sm:$0xff]  ;;  %v540_v12 = vld [vmem:[%s1726_s9 + $0x60] sm:$0xff]  ;;  %v539_v14 = vld [vmem:[%s1726_s9 + $0x58] sm:$0xff] }
  0x8a   : > { %920 = vmatpush3.msra.mxu0 %v422_v2  ;;  %955 = vmatprep.subr.mxu1 %v543_v7  ;;  %v417_v11 = vld [vmem:[%s1709_s1 + $0x48] sm:$0xff]  ;;  %v416_v13 = vld [vmem:[%s1709_s1 + $0x40] sm:$0xff]  ;;  %v415_v15 = vld [vmem:[%s1709_s1 + $0x38] sm:$0xff]  ;;  %p1227_p0 = pnand %p1226_p1, %p1652_p7 }
  0x8b   : > { %921 = vmatprep.subr.mxu0 %v421_v3  ;;  %956 = vmatpush3.msra.mxu1 %v543_v7  ;;  %v538_v16 = vld [vmem:[%s1726_s9 + $0x50] sm:$0xff]  ;;  %v537_v18 = vld [vmem:[%s1726_s9 + $0x48] sm:$0xff]  ;;  %v536_v20 = vld [vmem:[%s1726_s9 + $0x40] sm:$0xff] }
  0x8c   : > { %922 = vmatpush3.msra.mxu0 %v421_v3  ;;  %957 = vmatprep.subr.mxu1 %v542_v8  ;;  %v414_v17 = vld [vmem:[%s1709_s1 + $0x30] sm:$0xff]  ;;  %v413_v19 = vld [vmem:[%s1709_s1 + $0x28] sm:$0xff]  ;;  %v412_v21 = vld [vmem:[%s1709_s1 + $0x20] sm:$0xff]  ;;  %p1228_p11 = pneg %p1227_p0 }
  0x8d   : > { %923 = vmatprep.subr.mxu0 %v420_v4  ;;  %958 = vmatpush3.msra.mxu1 %v542_v8  ;;  %v535_v22 = vld [vmem:[%s1726_s9 + $0x38] sm:$0xff]  ;;  %v534_v24 = vld [vmem:[%s1726_s9 + $0x30] sm:$0xff]  ;;  %v533_v26 = vld [vmem:[%s1726_s9 + $0x28] sm:$0xff] }
  0x8e   : > { %924 = vmatpush3.msra.mxu0 %v420_v4  ;;  %959 = vmatprep.subr.mxu1 %v541_v10  ;;  %v411_v23 = vld [vmem:[%s1709_s1 + $0x18] sm:$0xff]  ;;  %v410_v25 = vld [vmem:[%s1709_s1 + $0x10] sm:$0xff]  ;;  %v409_v27 = vld [vmem:[%s1709_s1 + $0x8] sm:$0xff] }
  0x8f   : > { %925 = vmatprep.subr.mxu0 %v419_v6  ;;  %960 = vmatpush3.msra.mxu1 %v541_v10  ;;  %v532_v28 = vld [vmem:[%s1726_s9 + $0x20] sm:$0xff]  ;;  %v405_v30 = vld [vmem:[%s1701_s16 + $0x8] sm:$0xff]  ;;  %v406_v31 = vld [vmem:[%s1701_s16 + $0x10] sm:$0xff] }
  0x90   : > { %926 = vmatpush3.msra.mxu0 %v419_v6  ;;  %961 = vmatprep.subr.mxu1 %v540_v12  ;;  %v408_v29 = vld [vmem:[%s1709_s1] sm:$0xff]  ;;  %v407_v32 = vld [vmem:[%s1701_s16 + $0x18] sm:$0xff]  ;;  %v530_v34 = vld [vmem:[%s1726_s9 + $0x10] sm:$0xff]  ;;  %s1991_s16 = sld [smem:[#allocation19_spill]] }
  0x91   : > { %927 = vmatprep.subr.mxu0 %v418_v9  ;;  %962 = vmatpush3.msra.mxu1 %v540_v12  ;;  %v531_v33 = vld [vmem:[%s1726_s9 + $0x18] sm:$0xff]  ;;  %v529_v35 = vld [vmem:[%s1726_s9 + $0x8] sm:$0xff]  ;;  %v528_v36 = vld [vmem:[%s1726_s9] sm:$0xff]  ;;  %s1797_s9 = scalar_lea.sflag [#allocation10], %s379_s12 }
  0x92   : > { %928 = vmatpush3.msra.mxu0 %v418_v9  ;;  %963 = vmatprep.subr.mxu1 %v539_v14  ;;  %v864_v37 = vld [vmem:[%s385_s26] ss:$0 sm:$0xff] }
  0x93   : > { %929 = vmatprep.subr.mxu0 %v417_v11  ;;  %964 = vmatpush3.msra.mxu1 %v539_v14 }
  0x94   : > { %930 = vmatpush3.msra.mxu0 %v417_v11  ;;  %965 = vmatprep.subr.mxu1 %v538_v16 }
  0x95   : > { %931 = vmatprep.subr.mxu0 %v416_v13  ;;  %966 = vmatpush3.msra.mxu1 %v538_v16 }
  0x96   : > { %932 = vmatpush3.msra.mxu0 %v416_v13  ;;  %967 = vmatprep.subr.mxu1 %v537_v18  ;;  %s993_s1 = smul.u32 12, %s1991_s16 }
  0x97   : > { %933 = vmatprep.subr.mxu0 %v415_v15  ;;  %968 = vmatpush3.msra.mxu1 %v537_v18 }
  0x98   : > { %934 = vmatpush3.msra.mxu0 %v415_v15  ;;  %969 = vmatprep.subr.mxu1 %v536_v20  ;;  %s671_s19 = sadd.s32 %s1992_s11, %s993_s1 }
  0x99   : > { %935 = vmatprep.subr.mxu0 %v414_v17  ;;  %970 = vmatpush3.msra.mxu1 %v536_v20  ;;  %s871_s15 = sshll.u32 %s671_s19, 7 }
  0x9a   : > { %936 = vmatpush3.msra.mxu0 %v414_v17  ;;  %971 = vmatprep.subr.mxu1 %v535_v22  ;;  %s1791_s26 = scalar_lea.hbm %s1993_s4, %s871_s15 }
  0x9b   : > { %937 = vmatprep.subr.mxu0 %v413_v19  ;;  %972 = vmatpush3.msra.mxu1 %v535_v22 }
  0x9c   : > { %938 = vmatpush3.msra.mxu0 %v413_v19  ;;  %973 = vmatprep.subr.mxu1 %v534_v24 }
  0x9d   : > { %939 = vmatprep.subr.mxu0 %v412_v21  ;;  %974 = vmatpush3.msra.mxu1 %v534_v24 }
  0x9e   : > { %940 = vmatpush3.msra.mxu0 %v412_v21  ;;  %975 = vmatprep.subr.mxu1 %v533_v26 }
  0x9f   : > { %941 = vmatprep.subr.mxu0 %v411_v23  ;;  %976 = vmatpush3.msra.mxu1 %v533_v26 }
  0xa0   : > { %942 = vmatpush3.msra.mxu0 %v411_v23  ;;  %977 = vmatprep.subr.mxu1 %v532_v28 }
  0xa1   : > { %943 = vmatprep.subr.mxu0 %v410_v25  ;;  %978 = vmatpush3.msra.mxu1 %v532_v28 }
  0xa2   : > { %944 = vmatpush3.msra.mxu0 %v410_v25  ;;  %979 = vmatprep.subr.mxu1 %v531_v33 }
  0xa3   : > { %945 = vmatprep.subr.mxu0 %v409_v27  ;;  %980 = vmatpush3.msra.mxu1 %v531_v33 }
  0xa4   : > { %946 = vmatpush3.msra.mxu0 %v409_v27  ;;  %981 = vmatprep.subr.mxu1 %v530_v34 }
  0xa5   : > { %947 = vmatprep.subr.mxu0 %v408_v29  ;;  %982 = vmatpush3.msra.mxu1 %v530_v34 }
  0xa6   : > { %948 = vmatpush3.msra.mxu0 %v408_v29  ;;  %983 = vmatprep.subr.mxu1 %v529_v35 }
  0xa7   : > { %950 = vmatmul.mubr.f32.vlgmr.msra.gmra.mxu0 %v405_v30  ;;  %984 = vmatpush3.msra.mxu1 %v529_v35 }
  0xa8   : > { %952 = vmatprep.mubr.f32.mxu0 %v406_v31  ;;  %985 = vmatprep.subr.mxu1 %v528_v36 }
  0xa9   : > { %986 = vmatpush3.msra.mxu1 %v528_v36 }
  0xab   : > { %953 = vmatmul.mubr.f32.gmra.mxu0 %v407_v32 }
 0x167   : > { %v951_v38 = vpop.f32.mrf.mxu0 }
 0x168   : > { %v503_v39 = vadd.f32 %v951_v38, %v864_v37 }
 0x169   : > { %v497_v40 = vpop.f32.mrf.mxu0 }
 0x16a   : > { %v517_v41 = vmax.f32 %v503_v39, 0.0  ;;  %v498_v42 = vadd.f32 %v864_v37, %v497_v40 }
 0x16b   : > { %v954_v43 = vpop.f32.mrf.mxu0 }
 0x16c   : > { %521 = vst [vmem:[%s1730_s2 + $0x8] sm:$0xff] %v517_v41  ;;  %v516_v44 = vmax.f32 %v498_v42, 0.0  ;;  %v513_v45 = vadd.f32 %v954_v43, %v864_v37 }
 0x16d   : > { %v507_v46 = vpop.f32.mrf.mxu0 }
 0x16e   : > { %520 = vst [vmem:[%s1730_s2] sm:$0xff] %v516_v44  ;;  %v519_v47 = vmax.f32 %v513_v45, 0.0  ;;  %v508_v48 = vadd.f32 %v864_v37, %v507_v46  ;;  %987 = vmatprep.mubr.f32.mxu1 %v516_v44 }
 0x16f   : > { %988 = vmatmul.mubr.f32.vlgmr.msra.gmra.mxu1 %v517_v41 }
 0x170   : > { %523 = vst [vmem:[%s1730_s2 + $0x18] sm:$0xff] %v519_v47  ;;  %v518_v49 = vmax.f32 %v508_v48, 0.0 }
 0x172   : > { %522 = vst [vmem:[%s1730_s2 + $0x10] sm:$0xff] %v518_v49  ;;  %990 = vmatprep.mubr.f32.mxu1 %v518_v49  ;;  %s1229_s2 = sshll.u32 %s1411_s0, 4  ;;  %s1230_s2 = int_to_ptr.vmem [resolvable:$false] %s1229_s2 }
 0x173   : > { %991 = vmatmul.mubr.f32.gmra.mxu1 %v519_v47  ;;  %s1231_s6 = scalar_lea.vmem %s1230_s2, 1024  ;;  %p1232_p4 = scmp.lt.s32.totalorder %s1793_s14, %s1230_s2 }
 0x174   : > { %p1233_p8 = scmp.lt.s32.totalorder %s1231_s6, %s1225_s7 }
 0x176   : > { %p1234_p3 = por %p1233_p8, %p1232_p4 }
 0x178   : > { %p1235_p12 = pnand %p1234_p3, %p1228_p11 }
 0x17a   : > { %1238 = shalt.err (!%p1235_p12)
}
 0x17b   : > { %s1239_s12 = scalar_lea.hbm %s1791_s26, 512  ;;  %s1243_s13 = scalar_lea.hbm %s1993_s4, 4608 }
 0x17c   : > { %p1240_p5 = scmp.ne.s32.totalorder %s1791_s26, %s1239_s12  ;;  %p1244_p2 = scmp.lt.s32.totalorder %s1791_s26, %s1993_s4 }
 0x17d   : > { %p1245_p6 = scmp.lt.s32.totalorder %s1243_s13, %s1239_s12 }
 0x17e   : > { %p1241_p9 = pnand %p1240_p5, %p1652_p7 }
 0x17f   : > { %p1246_p10 = por %p1245_p6, %p1244_p2 }
 0x180   : > { %p1242_p13 = pneg %p1241_p9 }
 0x182   : > { %p1247_p1 = pnand %p1246_p10, %p1242_p13 }
 0x184   : > { %1250 = shalt.err (!%p1247_p1)
}
 0x185   : > { %s1412_s19 = smov 128   ;;  %s1413_s15 = smov 384   ;;  %v525_v50 = vld [vmem:[%s1728_s5 + $0x8] sm:$0xff]  ;;  %v524_v52 = vld [vmem:[%s1728_s5] sm:$0xff]  ;;  %v527_v55 = vld [vmem:[%s1728_s5 + $0x18] sm:$0xff] }
 0x186   : > { %s1414_s17 = smov 8   ;;  %v526_v58 = vld [vmem:[%s1728_s5 + $0x10] sm:$0xff]  ;;  %s876_s24 = sshll.u32 %s1991_s16, 9 }
 0x187   : > { %1001 = dma.vmem_to_hbm [thread:$0]  (%p1652_p7), %s1793_s14, 512, %s1791_s26, %s1797_s9, %s1412_s19, %s1413_s15, %s1414_s17  }
 0x188   : > { %s656_s7 = sshll.u32 %s1728_s5, 4  ;;  %s1994_s26 = sld [smem:[#allocation33_spill]]  ;;  %s1836_s7 = int_to_ptr.vmem [resolvable:$true] %s656_s7 }
 0x189   : > { %s638_s2 = scalar_lea.sflag [#allocation4], %s1697_s23  ;;  %s1251_s6 = scalar_lea.vmem %s1836_s7, 512 }
 0x18a   : > { %p1252_p7 = scmp.ne.s32.totalorder %s1836_s7, %s1251_s6  ;;  %p1996_p0 = scmp.ne.s32.totalorder %s1974_s30, 0 }
 0x18b   : > { %s1415_s16 = smov [#allocation8]  }
 0x18c   : > { %p1253_p11 = pnand %p1252_p7, %p1996_p0  ;;  %s1255_s12 = sshll.u32 %s1415_s16, 4  ;;  %s1256_s12 = int_to_ptr.vmem [resolvable:$false] %s1255_s12 }
 0x18d   : > { %s1257_s27 = scalar_lea.vmem %s1256_s12, 1024  ;;  %p1258_p8 = scmp.lt.s32.totalorder %s1836_s7, %s1256_s12 }
 0x18e   : > { %s1995_s0 = smov %s1994_s26  ;;  %s1834_s9 = scalar_lea.hbm %s1994_s26, %s876_s24 }
 0x18f   : > { %p1254_p4 = pneg %p1253_p11  ;;  %p1259_p3 = scmp.lt.s32.totalorder %s1257_s27, %s1251_s6 }
 0x191   : > { %p1260_p12 = por %p1259_p3, %p1258_p8 }
 0x193   : > { %p1261_p5 = pnand %p1260_p12, %p1254_p4 }
 0x22f   : > { %v989_v51 = vpop.f32.mrf.mxu1 }
 0x230   : > { %v630_v53 = vadd.f32 %v989_v51, %v525_v50 }
 0x231   : > { %v610_v54 = vpop.f32.mrf.mxu1 }
 0x232   : > { %634 = vst [vmem:[%s1728_s5 + $0x8] sm:$0xff] %v630_v53  ;;  %v629_v56 = vadd.f32 %v610_v54, %v524_v52 }
 0x233   : > { %v992_v57 = vpop.f32.mrf.mxu1 }
 0x234   : > { %633 = vst [vmem:[%s1728_s5] sm:$0xff] %v629_v56  ;;  %v632_v59 = vadd.f32 %v992_v57, %v527_v55 }
 0x235   : > { %v620_v60 = vpop.f32.mrf.mxu1 }
 0x236   : > { %636 = vst [vmem:[%s1728_s5 + $0x18] sm:$0xff] %v632_v59  ;;  %v631_v61 = vadd.f32 %v620_v60, %v526_v58 }
 0x238   : > { %635 = vst [vmem:[%s1728_s5 + $0x10] sm:$0xff] %v631_v61 }
 0x239   : > { %1264 = shalt.err (!%p1261_p5)
}
 0x23a   : > { %s1265_s5 = scalar_lea.hbm %s1834_s9, 512  ;;  %s1269_s13 = scalar_lea.hbm %s1995_s0, 1536 }
 0x23b   : > { %p1266_p9 = scmp.ne.s32.totalorder %s1834_s9, %s1265_s5  ;;  %p1270_p6 = scmp.lt.s32.totalorder %s1834_s9, %s1995_s0 }
 0x23c   : > { %p1271_p10 = scmp.lt.s32.totalorder %s1269_s13, %s1265_s5 }
 0x23d   : > { %p1267_p13 = pnand %p1266_p9, %p1996_p0 }
 0x23e   : > { %p1272_p1 = por %p1271_p10, %p1270_p6 }
 0x23f   : > { %p1268_p2 = pneg %p1267_p13 }
 0x241   : > { %p1273_p7 = pnand %p1272_p1, %p1268_p2 }
 0x243   : > { %1276 = shalt.err (!%p1273_p7)
}
 0x244   : > { %1000 = dma.vmem_to_hbm [thread:$0]  (%p1996_p0), %s1836_s7, 512, %s1834_s9, %s638_s2, %s1412_s19, %s1412_s19, %s1414_s17  }
 0x245 PF: > { %s1997_s15 = sld [smem:[#allocation17_spill]]  ;;  %p1022_p11 = scmp.ge.s32.totalorder %s1403_s10, 2 }
 0x246   : > { %s1998_s24 = sld [smem:[#allocation27_spill]] }
 0x24b   : > { %s689_s20 = sand.u32 1, %s1997_s15  }
 0x24c   : > { %p1999_p4 = scmp.ne.s32.totalorder %s1998_s24, 0  ;;  %s690_s14 = scalar_lea.sflag [#allocation4], %s689_s20 }
 0x24e   : > { %p1015_p8 = pnand %p1022_p11, %p1999_p4 }
 0x250   : > { %p1016_p3 = pneg %p1015_p8 }
 0x252   : > { %1342 = dma.done.wait (%p1016_p3), %s690_s14, 512  }
 0x253   : > { %1344 = vsyncadd (%p1016_p3), %s690_s14, 4294966784  ;;  %s698_s30 = sand.u32 1, %s1351_s21   ;;  %p2000_p12 = scmp.ne.s32.totalorder %s1979_s18, 0 }
 0x254   : > { %s699_s26 = scalar_lea.sflag [#allocation10], %s698_s30 }
 0x255   : > { %p1018_p5 = pnand %p1022_p11, %p2000_p12 }
 0x257   : > { %p1019_p9 = pneg %p1018_p5 }
 0x259   : > { %1346 = dma.done.wait (%p1019_p9), %s699_s26, 512  }
 0x25a   : > { %1348 = vsyncadd (%p1019_p9), %s699_s26, 4294966784  ;;  %s29_s10 = sadd.s32 1, %s1403_s10   ;;  %s2002_s17 = sld [smem:[#allocation15_spill]] }
 0x25b   : > { %p1871_p0 = scmp.ge.s32.totalorder %s29_s10, 11   ;;  %s2003_s23 = sld [smem:[#allocation28_spill]] }
 0x25c   : > { %s2004_s7 = sld [smem:[#allocation16_spill]]  ;;  %s2011_s21 = smov %s1355_s22 }
 0x25d   : > { %s2005_s26 = sld [smem:[#allocation25_spill]]  ;;  %s2013_s24 = smov %s1367_s25 }
 0x25e   : > { %s2006_s18 = sld [smem:[#allocation26_spill]]  ;;  %s2015_s27 = smov %s1379_s28 }
 0x25f   : > { %s2007_s30 = sld [smem:[#allocation20_spill]]  ;;  %s2016_s28 = smov %s1383_s29 }
 0x260   : > { %s2008_s9 = sld [smem:[#allocation21_spill]]  ;;  %s2012_s22 = smov %s2002_s17 }
 0x261   : > { %s2009_s8 = sld [smem:[#allocation22_spill]] }
 0x262   : > { %s2010_s2 = sld [smem:[#allocation23_spill]]  ;;  %s2014_s25 = smov %s2004_s7 }
 0x264   : > { %s2017_s29 = smov %s2006_s18  ;;  %28 = sbr.rel (!%p1871_p0) target bundleno = 21 (0x15), region = 133 }
 0x266   : > { %s2018_s7 = smov %s2008_s9 }
 0x268   : > { %s2019_s9 = smov %s2010_s2 }
 0x269   :  { %704 = vsyncpa [#allocation3], 1 }
 0x26a   :  { %706 = vsyncpa [#allocation3 + $0x1], 1 }
 0x26b   :  { %707 = vsyncpa [#allocation6], 1 }
 0x26c   :  { %709 = vsyncpa [#allocation6 + $0x1], 1 }
 0x26d   :  { %710 = vsyncpa [#allocation4], 1 }
 0x26e   :  { %712 = vsyncpa [#allocation4 + $0x1], 1 }
 0x26f   :  { %713 = vsyncpa [#allocation10], 1 }
 0x270   :  { %715 = vsyncpa [#allocation10 + $0x1], 1 }

</bundles_post_ra>
